<compile_context>
chip_gen: v5e
topology: v5e:2x2
jax: 0.10.0
libtpu: 0.0.40
codegen_flags: <defaults>
</compile_context>

<pallas_src>
import functools

import jax
import jax.numpy as jnp
from jax import lax
from jax.experimental import pallas as pl
from jax.experimental.pallas import tpu as pltpu


def _round_up(x: int, m: int) -> int:
    return ((x + m - 1) // m) * m


def _choose_tm(M: int, block_m: int):
    """Largest multiple-of-8 divisor of M <= block_m; prefer an even grid (v7x)."""
    cands = [t for t in range(8, min(block_m, M) + 1, 8) if M % t == 0]
    if not cands:
        return None
    even = [t for t in cands if (M // t) % 2 == 0]
    return max(even) if even else max(cands)


def _tabformer_kernel(ids_ref, table_ref, w_ref, b_ref, out_ref, slab_ref,
                      *, v_chunk, col_group):
    """One (TM, C) tile of token rows -> (TM, H) projected embeddings."""
    TM, C = ids_ref.shape
    V, F = table_ref.shape

    ids = ids_ref[...]                                          # (TM, C) int32

    # Embedding lookup: per column, one-hot @ table, with the vocab axis tiled
    # in v_chunk slices so the live one-hot temp is (TM, v_chunk), not (TM, V).
    # TODO(synk): switch to an in-kernel row gather (SMEM-prefetched ids +
    # dynamic table_ref[id, :] reads) once that path is validated on Mosaic.
    for g0 in range(0, C, col_group):
        cols = []
        for c in range(g0, min(g0 + col_group, C)):
            idc = ids[:, c:c + 1]                               # (TM, 1)
            acc = jnp.zeros((TM, F), jnp.float32)
            for v0 in range(0, V, v_chunk):
                vc = min(v_chunk, V - v0)
                iota = v0 + lax.broadcasted_iota(jnp.int32, (1, vc), 1)
                onehot = (idc == iota).astype(jnp.bfloat16)     # (TM, vc)
                acc = acc + jnp.dot(onehot, table_ref[pl.ds(v0, vc), :],
                                    preferred_element_type=jnp.float32)
            cols.append(acc)
        grp = cols[0] if len(cols) == 1 else jnp.concatenate(cols, axis=1)
        slab_ref[:, pl.ds(g0 * F, grp.shape[1])] = grp.astype(slab_ref.dtype)

    # Fused projection: one (TM, C*F) @ (C*F, H) matmul + bias, one store.
    out_ref[...] = (jnp.dot(slab_ref[...], w_ref[...],
                            preferred_element_type=jnp.float32)
                    + b_ref[...]).astype(out_ref.dtype)


def tabformer_concat_embeddings(input_ids, emb_table, lin_w, lin_b, *,
                                field_hidden_size, hidden_size,
                                block_m=512, v_chunk=512,
                                out_dtype=jnp.float32):
    """input_ids: (B, S, C) int; emb_table: (V, F); lin_w: (H, C*F); lin_b: (H,)."""
    B, S, C = input_ids.shape
    V, F = emb_table.shape
    H = hidden_size
    assert F == field_hidden_size
    assert lin_w.shape == (H, C * F)
    assert lin_b.shape == (H,)

    M = B * S
    TM = _choose_tm(M, block_m)
    if TM is None:
        # Ragged fallback: pad with id 0 (padding_idx -> zero row), slice below.
        TM = min(block_m, _round_up(M, 8))
        Mp = _round_up(M, TM)
    else:
        Mp = M

    ids2d = input_ids.reshape(M, C).astype(jnp.int32)
    if Mp != M:
        ids2d = jnp.pad(ids2d, ((0, Mp - M), (0, 0)))

    # bf16 MXU operands, f32 accumulation; bias and output stay f32.
    table = emb_table.astype(jnp.bfloat16)                 # (V, F)
    w_t = lin_w.T.astype(jnp.bfloat16)                     # (C*F, H)
    b2d = lin_b.reshape(1, H).astype(jnp.float32)          # (1, H)

    vc = min(v_chunk, V)
    # Column-group width for slab stores: reach >=128 lanes when F divides 128.
    col_group = min(C, max(1, 128 // F)) if (F <= 128 and 128 % F == 0) else 1

    grid = (Mp // TM,)

    # VMEM budget: double-buffered ids/out tiles + residents (still double
    # buffered) + bf16 slab + transient one-hot / accumulator temps.
    # TODO(synk): mark the constant-index residents with
    # pipeline_mode=pl.Buffered(1) once single-buffered residents are confirmed
    # supported by the installed Mosaic; that halves their VMEM footprint.
    resident = V * F * 2 + C * F * H * 2 + H * 4
    per_tile = TM * C * 4 + TM * H * jnp.dtype(out_dtype).itemsize
    slab_bytes = TM * C * F * 2
    temps = TM * vc * 4 + TM * col_group * F * 4 + vc * F * 2
    need = 2 * (resident + per_tile) + slab_bytes + temps
    vmem_limit = min(int(need * 1.5) + (8 << 20), 56 << 20)

    cost = pl.CostEstimate(
        flops=2 * Mp * C * V * F + 2 * Mp * (C * F) * H,
        transcendentals=0,
        bytes_accessed=(Mp * C * 4 + V * F * 2 + C * F * H * 2 + H * 4
                        + Mp * H * jnp.dtype(out_dtype).itemsize),
    )

    kernel = functools.partial(_tabformer_kernel, v_chunk=vc,
                               col_group=col_group)

    out = pl.pallas_call(
        kernel,
        out_shape=jax.ShapeDtypeStruct((Mp, H), out_dtype),
        grid_spec=pltpu.PrefetchScalarGridSpec(
            num_scalar_prefetch=0,
            grid=grid,
            in_specs=[
                pl.BlockSpec((TM, C), lambda i: (i, 0)),      # ids tile
                pl.BlockSpec((V, F), lambda i: (0, 0)),       # table (resident)
                pl.BlockSpec((C * F, H), lambda i: (0, 0)),   # weights (resident)
                pl.BlockSpec((1, H), lambda i: (0, 0)),       # bias (resident)
            ],
            out_specs=pl.BlockSpec((TM, H), lambda i: (i, 0)),
            scratch_shapes=[pltpu.VMEM((TM, C * F), jnp.bfloat16)],
        ),
        compiler_params=pltpu.CompilerParams(
            dimension_semantics=("parallel",),
            vmem_limit_bytes=vmem_limit),
        cost_estimate=cost,
    )(ids2d, table, w_t, b2d)

    if Mp != M:
        out = out[:M]
    return out.reshape(B, S, H)


def reference_forward(input_ids, emb_table, lin_w, lin_b, field_hidden_size):
    B, S, C = input_ids.shape
    emb = jnp.take(emb_table, input_ids, axis=0)               # (B, S, C, F)
    flat = emb.reshape(B, S, C * field_hidden_size)
    return flat @ lin_w.T + lin_b


if __name__ == "__main__":
    # Small config consistent with the module.
    batch, seq_len, ncols = 2, 8, 4
    vocab_size = 64
    field_hidden_size = 16
    hidden_size = 32
    pad_token_id = 0

    key = jax.random.PRNGKey(0)
    k_ids, k_emb, k_w, k_b = jax.random.split(key, 4)

    input_ids = jax.random.randint(
        k_ids, (batch, seq_len, ncols), minval=0, maxval=vocab_size,
        dtype=jnp.int32)

    # nn.Embedding ~ N(0,1); padding row zeroed (padding_idx=0).
    emb_table = jax.random.normal(
        k_emb, (vocab_size, field_hidden_size), dtype=jnp.float32)
    emb_table = emb_table.at[pad_token_id].set(0.0)

    # nn.Linear(C*F, H): weight (H, C*F), bias (H,)
    fan_in = ncols * field_hidden_size
    bound = fan_in ** -0.5
    lin_w = jax.random.uniform(
        k_w, (hidden_size, fan_in), minval=-bound, maxval=bound,
        dtype=jnp.float32)
    lin_b = jax.random.uniform(
        k_b, (hidden_size,), minval=-bound, maxval=bound, dtype=jnp.float32)

    out = tabformer_concat_embeddings(
        input_ids, emb_table, lin_w, lin_b,
        field_hidden_size=field_hidden_size, hidden_size=hidden_size)
    out = jax.block_until_ready(out)
    assert out.shape == (batch, seq_len, hidden_size), out.shape

    # Tight check vs a bf16-operand reference (same quantization as the kernel's
    # MXU path, f32 accumulation).
    emb_bf = jnp.take(emb_table.astype(jnp.bfloat16), input_ids, axis=0)
    flat_bf = emb_bf.reshape(batch, seq_len, fan_in)
    ref_bf = jnp.dot(flat_bf, lin_w.T.astype(jnp.bfloat16),
                     preferred_element_type=jnp.float32) + lin_b
    assert jnp.allclose(out, ref_bf, atol=1e-4, rtol=1e-4), (
        float(jnp.max(jnp.abs(out - ref_bf))))

    # Loose check vs the full-f32 PyTorch-equivalent reference (bf16 operand
    # rounding only).
    ref_f32 = reference_forward(input_ids, emb_table, lin_w, lin_b,
                                field_hidden_size)
    assert jnp.allclose(out, ref_f32, atol=5e-2, rtol=5e-2), (
        float(jnp.max(jnp.abs(out - ref_f32))))

    print("KERNEL_OK")
</pallas_src>

<mosaic_0001>
module attributes {stable_mosaic.version = 11 : i64} {
  func.func @_tabformer_kernel(%arg0: i32, %arg1: memref<8x4xi32, #tpu.memory_space<vmem>>, %arg2: memref<64x16xbf16, #tpu.memory_space<vmem>>, %arg3: memref<64x32xbf16, #tpu.memory_space<vmem>>, %arg4: memref<1x32xf32, #tpu.memory_space<vmem>>, %arg5: memref<8x32xf32, #tpu.memory_space<vmem>>, %arg6: memref<8x64xbf16, #tpu.memory_space<vmem>>) attributes {dimension_semantics = [#tpu.dimension_semantics<parallel>], iteration_bounds = array<i64: 2>, scalar_prefetch = 0 : i64, scratch_operands = 1 : i64, tpu.core_type = #tpu.core_type<tc>, window_params = [{transform_indices = @transform_0, window_bounds = array<i64: 8, 4>}, {pipeline_mode = #tpu.pipeline_mode<synchronous>, transform_indices = @transform_1, window_bounds = array<i64: 64, 16>}, {pipeline_mode = #tpu.pipeline_mode<synchronous>, transform_indices = @transform_2, window_bounds = array<i64: 64, 32>}, {pipeline_mode = #tpu.pipeline_mode<synchronous>, transform_indices = @transform_3, window_bounds = array<i64: 1, 32>}, {transform_indices = @transform_4, window_bounds = array<i64: 8, 32>}]} {
    %c0 = arith.constant 0 : index
    %c0_0 = arith.constant 0 : index
    %0 = vector.load %arg1[%c0, %c0_0] : memref<8x4xi32, #tpu.memory_space<vmem>>, vector<8x4xi32>
    %1 = vector.extract_strided_slice %0 {offsets = [0, 0], sizes = [8, 1], strides = [1, 1]} : vector<8x4xi32> to vector<8x1xi32>
    %cst = arith.constant 0.000000e+00 : f32
    %2 = vector.broadcast %cst : f32 to vector<8x16xf32>
    %3 = tpu.iota {dimensions = array<i32: 1>} : vector<1x64xi32>
    %c0_i32 = arith.constant 0 : i32
    %4 = vector.broadcast %c0_i32 : i32 to vector<1x64xi32>
    %5 = arith.addi %4, %3 : vector<1x64xi32>
    %6 = vector.broadcast %1 : vector<8x1xi32> to vector<8x64xi32>
    %7 = vector.broadcast %5 : vector<1x64xi32> to vector<8x64xi32>
    %8 = arith.cmpi eq, %6, %7 : vector<8x64xi32>
    %9 = arith.extui %8 : vector<8x64xi1> to vector<8x64xi32>
    %10 = arith.sitofp %9 : vector<8x64xi32> to vector<8x64xf32>
    %11 = arith.truncf %10 : vector<8x64xf32> to vector<8x64xbf16>
    %c0_1 = arith.constant 0 : index
    %c0_2 = arith.constant 0 : index
    %12 = vector.load %arg2[%c0_1, %c0_2] : memref<64x16xbf16, #tpu.memory_space<vmem>>, vector<64x16xbf16>
    %cst_3 = arith.constant dense<0.000000e+00> : vector<8x16xf32>
    %13 = tpu.matmul %11, %12, %cst_3 {dimension_numbers = #tpu.dot_dimension_numbers<[1], [0], [0], [1], [0, 0, 1, 1], [], []>} : vector<8x64xbf16>, vector<64x16xbf16>, vector<8x16xf32> -> vector<8x16xf32>
    %14 = arith.addf %2, %13 : vector<8x16xf32>
    %15 = vector.extract_strided_slice %0 {offsets = [0, 1], sizes = [8, 1], strides = [1, 1]} : vector<8x4xi32> to vector<8x1xi32>
    %cst_4 = arith.constant 0.000000e+00 : f32
    %16 = vector.broadcast %cst_4 : f32 to vector<8x16xf32>
    %17 = tpu.iota {dimensions = array<i32: 1>} : vector<1x64xi32>
    %c0_i32_5 = arith.constant 0 : i32
    %18 = vector.broadcast %c0_i32_5 : i32 to vector<1x64xi32>
    %19 = arith.addi %18, %17 : vector<1x64xi32>
    %20 = vector.broadcast %15 : vector<8x1xi32> to vector<8x64xi32>
    %21 = vector.broadcast %19 : vector<1x64xi32> to vector<8x64xi32>
    %22 = arith.cmpi eq, %20, %21 : vector<8x64xi32>
    %23 = arith.extui %22 : vector<8x64xi1> to vector<8x64xi32>
    %24 = arith.sitofp %23 : vector<8x64xi32> to vector<8x64xf32>
    %25 = arith.truncf %24 : vector<8x64xf32> to vector<8x64xbf16>
    %c0_6 = arith.constant 0 : index
    %c0_7 = arith.constant 0 : index
    %26 = vector.load %arg2[%c0_6, %c0_7] : memref<64x16xbf16, #tpu.memory_space<vmem>>, vector<64x16xbf16>
    %cst_8 = arith.constant dense<0.000000e+00> : vector<8x16xf32>
    %27 = tpu.matmul %25, %26, %cst_8 {dimension_numbers = #tpu.dot_dimension_numbers<[1], [0], [0], [1], [0, 0, 1, 1], [], []>} : vector<8x64xbf16>, vector<64x16xbf16>, vector<8x16xf32> -> vector<8x16xf32>
    %28 = arith.addf %16, %27 : vector<8x16xf32>
    %29 = vector.extract_strided_slice %0 {offsets = [0, 2], sizes = [8, 1], strides = [1, 1]} : vector<8x4xi32> to vector<8x1xi32>
    %cst_9 = arith.constant 0.000000e+00 : f32
    %30 = vector.broadcast %cst_9 : f32 to vector<8x16xf32>
    %31 = tpu.iota {dimensions = array<i32: 1>} : vector<1x64xi32>
    %c0_i32_10 = arith.constant 0 : i32
    %32 = vector.broadcast %c0_i32_10 : i32 to vector<1x64xi32>
    %33 = arith.addi %32, %31 : vector<1x64xi32>
    %34 = vector.broadcast %29 : vector<8x1xi32> to vector<8x64xi32>
    %35 = vector.broadcast %33 : vector<1x64xi32> to vector<8x64xi32>
    %36 = arith.cmpi eq, %34, %35 : vector<8x64xi32>
    %37 = arith.extui %36 : vector<8x64xi1> to vector<8x64xi32>
    %38 = arith.sitofp %37 : vector<8x64xi32> to vector<8x64xf32>
    %39 = arith.truncf %38 : vector<8x64xf32> to vector<8x64xbf16>
    %c0_11 = arith.constant 0 : index
    %c0_12 = arith.constant 0 : index
    %40 = vector.load %arg2[%c0_11, %c0_12] : memref<64x16xbf16, #tpu.memory_space<vmem>>, vector<64x16xbf16>
    %cst_13 = arith.constant dense<0.000000e+00> : vector<8x16xf32>
    %41 = tpu.matmul %39, %40, %cst_13 {dimension_numbers = #tpu.dot_dimension_numbers<[1], [0], [0], [1], [0, 0, 1, 1], [], []>} : vector<8x64xbf16>, vector<64x16xbf16>, vector<8x16xf32> -> vector<8x16xf32>
    %42 = arith.addf %30, %41 : vector<8x16xf32>
    %43 = vector.extract_strided_slice %0 {offsets = [0, 3], sizes = [8, 1], strides = [1, 1]} : vector<8x4xi32> to vector<8x1xi32>
    %cst_14 = arith.constant 0.000000e+00 : f32
    %44 = vector.broadcast %cst_14 : f32 to vector<8x16xf32>
    %45 = tpu.iota {dimensions = array<i32: 1>} : vector<1x64xi32>
    %c0_i32_15 = arith.constant 0 : i32
    %46 = vector.broadcast %c0_i32_15 : i32 to vector<1x64xi32>
    %47 = arith.addi %46, %45 : vector<1x64xi32>
    %48 = vector.broadcast %43 : vector<8x1xi32> to vector<8x64xi32>
    %49 = vector.broadcast %47 : vector<1x64xi32> to vector<8x64xi32>
    %50 = arith.cmpi eq, %48, %49 : vector<8x64xi32>
    %51 = arith.extui %50 : vector<8x64xi1> to vector<8x64xi32>
    %52 = arith.sitofp %51 : vector<8x64xi32> to vector<8x64xf32>
    %53 = arith.truncf %52 : vector<8x64xf32> to vector<8x64xbf16>
    %c0_16 = arith.constant 0 : index
    %c0_17 = arith.constant 0 : index
    %54 = vector.load %arg2[%c0_16, %c0_17] : memref<64x16xbf16, #tpu.memory_space<vmem>>, vector<64x16xbf16>
    %cst_18 = arith.constant dense<0.000000e+00> : vector<8x16xf32>
    %55 = tpu.matmul %53, %54, %cst_18 {dimension_numbers = #tpu.dot_dimension_numbers<[1], [0], [0], [1], [0, 0, 1, 1], [], []>} : vector<8x64xbf16>, vector<64x16xbf16>, vector<8x16xf32> -> vector<8x16xf32>
    %56 = arith.addf %44, %55 : vector<8x16xf32>
    %57 = tpu.concatenate %14, %28, %42, %56 in 1 : vector<8x16xf32>, vector<8x16xf32>, vector<8x16xf32>, vector<8x16xf32> -> vector<8x64xf32>
    %58 = arith.truncf %57 : vector<8x64xf32> to vector<8x64xbf16>
    %c0_19 = arith.constant 0 : index
    %c0_20 = arith.constant 0 : index
    %59 = vector.load %arg6[%c0_19, %c0_20] : memref<8x64xbf16, #tpu.memory_space<vmem>>, vector<8x64xbf16>
    tpu.vector_store %arg6[%c0_19, %c0_20], %58 {strides = array<i32>} : memref<8x64xbf16, #tpu.memory_space<vmem>>, vector<8x64xbf16>,
    %c0_21 = arith.constant 0 : index
    %c0_22 = arith.constant 0 : index
    %60 = vector.load %arg6[%c0_21, %c0_22] : memref<8x64xbf16, #tpu.memory_space<vmem>>, vector<8x64xbf16>
    %c0_23 = arith.constant 0 : index
    %c0_24 = arith.constant 0 : index
    %61 = vector.load %arg3[%c0_23, %c0_24] : memref<64x32xbf16, #tpu.memory_space<vmem>>, vector<64x32xbf16>
    %cst_25 = arith.constant dense<0.000000e+00> : vector<8x32xf32>
    %62 = tpu.matmul %60, %61, %cst_25 {dimension_numbers = #tpu.dot_dimension_numbers<[1], [0], [0], [1], [0, 0, 1, 1], [], []>} : vector<8x64xbf16>, vector<64x32xbf16>, vector<8x32xf32> -> vector<8x32xf32>
    %c0_26 = arith.constant 0 : index
    %c0_27 = arith.constant 0 : index
    %63 = vector.load %arg4[%c0_26, %c0_27] : memref<1x32xf32, #tpu.memory_space<vmem>>, vector<1x32xf32>
    %64 = vector.broadcast %63 : vector<1x32xf32> to vector<8x32xf32>
    %65 = arith.addf %62, %64 : vector<8x32xf32>
    %c0_28 = arith.constant 0 : index
    %c0_29 = arith.constant 0 : index
    %66 = vector.load %arg5[%c0_28, %c0_29] : memref<8x32xf32, #tpu.memory_space<vmem>>, vector<8x32xf32>
    tpu.vector_store %arg5[%c0_28, %c0_29], %65 {strides = array<i32>} : memref<8x32xf32, #tpu.memory_space<vmem>>, vector<8x32xf32>,
    return
  }
  func.func @transform_0(%arg0: i32) -> (i32, i32) {
    %c0_i32 = arith.constant 0 : i32
    %c0_i32_0 = arith.constant 0 : i32
    return %arg0, %c0_i32 : i32, i32
  }
  func.func @transform_1(%arg0: i32) -> (i32, i32) {
    %c0_i32 = arith.constant 0 : i32
    %c0_i32_0 = arith.constant 0 : i32
    %c0_i32_1 = arith.constant 0 : i32
    return %c0_i32, %c0_i32_0 : i32, i32
  }
  func.func @transform_2(%arg0: i32) -> (i32, i32) {
    %c0_i32 = arith.constant 0 : i32
    %c0_i32_0 = arith.constant 0 : i32
    %c0_i32_1 = arith.constant 0 : i32
    return %c0_i32, %c0_i32_0 : i32, i32
  }
  func.func @transform_3(%arg0: i32) -> (i32, i32) {
    %c0_i32 = arith.constant 0 : i32
    %c0_i32_0 = arith.constant 0 : i32
    %c0_i32_1 = arith.constant 0 : i32
    return %c0_i32, %c0_i32_0 : i32, i32
  }
  func.func @transform_4(%arg0: i32) -> (i32, i32) {
    %c0_i32 = arith.constant 0 : i32
    %c0_i32_0 = arith.constant 0 : i32
    return %arg0, %c0_i32 : i32, i32
  }
}

</mosaic_0001>

<bundles_post_ra>
// kernel: tpu_custom_call.1
= control target key start
LH: loop header
LB: loop body
LE: loop exit
PB: predicated region body
PF: predicated region fallthrough
CT: control target
= control target key end

     0   :  { %9 = vsyncpa [#allocation4], 0  ;;  %s799_s0 = inlined_call_operand.vmem [shape: s32[16,4], index: 0, kind: input, shape index: {}]   ;;  %s800_s1 = inlined_call_operand.vmem [shape: bf16[64,16], index: 1, kind: input, shape index: {}]   ;;  %s801_s2 = inlined_call_operand.vmem [shape: bf16[64,32], index: 2, kind: input, shape index: {}]   ;;  %s802_s3 = inlined_call_operand.vmem [shape: f32[1,32], index: 3, kind: input, shape index: {}]   ;;  %s803_s4 = inlined_call_operand.hbm [shape: f32[16,32], index: 4, kind: output, shape index: {}]  }
   0x1   :  { %11 = vsyncpa [#allocation4 + $0x1], 0  ;;  %s680_s15 = smov 0   ;;  %s682_s16 = smov 0  }
   0x2   :  { %s684_s17 = smov 0   ;;  %s686_s18 = smov 0  }
   0x3 LB: > { %s701_s19 = sadd.s32 4294967295, %s645_s18   ;;  %s472_s20 = sadd.s32 4294967294, %s645_s18   ;;  %s645_s18 = sphi %s686_s18, %s809_s18   ;;  %s641_s17 = sphi %s684_s17, %s808_s17   ;;  %s637_s16 = sphi %s682_s16, %s807_s16   ;;  %s633_s15 = sphi %s680_s15, %s806_s15  }
   0x4   : > { %s705_s21 = sadd.s32 1, %s645_s18   ;;  %s113_s22 = sadd.s32 1, %s641_s17 }
   0x5   : > { %s110_s23 = ssub.s32 %s645_s18, %s705_s21  ;;  %p123_p0 = scmp.ne.s32.totalorder %s641_s17, %s637_s16 }
   0x6   : > { %p111_p1 = scmp.eq.s32.totalorder %s110_s23, 0  ;;  %p124_p2 = scmp.eq.s32.totalorder %s701_s19, 1 }
   0x7   : > { %p129_p3 = scmp.ne.s32.totalorder %s637_s16, %s633_s15  ;;  %p130_p4 = scmp.eq.s32.totalorder %s472_s20, 1 }
   0x8   : > { %s716_s24 = scalar_select %p111_p1, %s641_s17, %s113_s22  }
   0x9   : > { %p718_p5 = por %p124_p2, %p123_p0  ;;  %p722_p6 = por %p130_p4, %p129_p3 }
   0xa   : > { %p475_p7 = scmp.ge.s32.totalorder %s645_s18, 1  ;;  %p164_p8 = scmp.lt.s32.totalorder %s645_s18, 3 }
   0xc   : > { %p165_p9 = pnand %p475_p7, %p164_p8 }
   0xd   : > { %p189_p10 = scmp.lt.s32.totalorder (!%p165_p9), %s701_s19, 1  ;;  %s652_s14 = smov (!%p165_p9), 16  }
   0xe   : > { %168 = sbr.rel (%p165_p9) target bundleno = 544 (0x220), region = 36  ;;  %s653_s20 = smov (!%p165_p9), 32  }
   0xf   : > { %s654_s22 = smov (!%p165_p9), 48   ;;  %s186_s8 = sand.u32 (!%p165_p9), 1, %s637_s16  }
  0x10   : > { %s476_s10 = sshll.u32 (!%p165_p9), %s186_s8, 3 }
  0x13   : > { %v526_v0 = vld [vmem:[%s800_s1 + $0x18] sm:$0xff]  ;;  %v647_v1 = vmov 2   ;;  %v648_v2 = vmov 1   ;;  %s190_s29 = scalar_select %p189_p10, %s701_s19, 1  ;;  %v525_v3 = vld [vmem:[%s800_s1 + $0x10] sm:$0xff]  ;;  %v524_v5 = vld [vmem:[%s800_s1 + $0x8] sm:$0xff]  ;;  %v195_v9 = vlaneseq }
  0x14   : > { %578 = vset.pattern.permute.xlu0 %v647_v1  ;;  %580 = vset.pattern.permute.xlu1 %v648_v2  ;;  %v649_v6 = vmov 3   ;;  %v650_v7 = vmov 0   ;;  %v523_v8 = vld [vmem:[%s800_s1] sm:$0xff]  ;;  %v651_v13 = vmov 0.0   ;;  %vm236_vm2 = vcmask 523264   ;;  %v530_v32 = vld [vmem:[%s801_s2 + $0x18] sm:$0xff] }
  0x15   : > { %267 = vmatpush.bf16.msra.mxu1 %v526_v0  ;;  %290 = vmatpush.bf16.msra.mxu2 %v526_v0  ;;  %s477_s6 = sshll.u32 %s190_s29, 3  ;;  %v196_v10 = vand.u32 127, %v195_v9  ;;  %v529_v33 = vld [vmem:[%s801_s2 + $0x10] sm:$0xff]  ;;  %v528_v34 = vld [vmem:[%s801_s2 + $0x8] sm:$0xff]  ;;  %v527_v35 = vld [vmem:[%s801_s2] sm:$0xff]  ;;  %vm334_vm5 = vcmask 130048  }
  0x16   : > { %313 = vmatpush.bf16.msra.mxu3 %v526_v0  ;;  %244 = vmatpush.bf16.msra.mxu0 %v526_v0  ;;  %s192_s9 = scalar_lea.vmem %s799_s0, %s477_s6  ;;  %vm336_vm6 = vcmask 261120   ;;  %vm338_vm7 = vcmask 392192   ;;  %vm341_vm8 = vcmask 519168   ;;  %v582_v44 = vld [vmem:[%s802_s3] ss:$0 sm:$0xff]  ;;  %s603_s6 = scalar_lea.hbm %s803_s4, 16 }
  0x17   : > { %v194_v4 = vld [vmem:[%s192_s9] sm:$0xff]  ;;  %s520_s9 = sshll.u32 %s701_s19, 3  ;;  %s398_s19 = scalar_lea.sflag [#allocation4], %s186_s8 }
  0x18   : > { %254 = vperm.xlu1 %580, %v194_v4   ;;  %277 = vperm.xlu0 %578, %v194_v4   ;;  %s408_s13 = scalar_lea.hbm %s803_s4, %s520_s9 }
  0x19   : > { %268 = vmatpush.bf16.msra.mxu1 %v525_v3  ;;  %291 = vmatpush.bf16.msra.mxu2 %v525_v3  ;;  %s412_s27 = sshll.u32 %s408_s13, 4  ;;  %s413_s27 = int_to_ptr.hbm [resolvable:$true] %s412_s27 }
  0x1a   : > { %314 = vmatpush.bf16.msra.mxu3 %v525_v3  ;;  %245 = vmatpush.bf16.msra.mxu0 %v525_v3  ;;  %s597_s28 = sshra.s32 %s413_s27, 4  ;;  %s598_s28 = int_to_ptr.hbm [resolvable:$true] %s597_s28 }
  0x1b   : > { %s599_s29 = scalar_lea.hbm %s598_s28, 8  ;;  %p604_p0 = scmp.lt.s32.totalorder %s598_s28, %s803_s4 }
  0x1c   : > { %p600_p11 = scmp.ne.s32.totalorder %s598_s28, %s599_s29  ;;  %p605_p1 = scmp.lt.s32.totalorder %s603_s6, %s599_s29 }
  0x1d   : > { %269 = vmatpush.bf16.msra.mxu1 %v524_v5  ;;  %292 = vmatpush.bf16.msra.mxu2 %v524_v5 }
  0x1e   : > { %315 = vmatpush.bf16.msra.mxu3 %v524_v5  ;;  %246 = vmatpush.bf16.msra.mxu0 %v524_v5  ;;  %p601_p12 = pnand %p600_p11, %p718_p5  ;;  %p606_p2 = por %p605_p1, %p604_p0 }
  0x20   : > { %579 = vset.pattern.permute.xlu0 %v649_v6  ;;  %581 = vset.pattern.permute.xlu1 %v650_v7  ;;  %p602_p13 = pneg %p601_p12 }
  0x21   : > { %300 = vperm.xlu0 %579, %v194_v4   ;;  %198 = vperm.xlu1 %581, %v194_v4  }
  0x22   : > { %270 = vmatpush.bf16.msra.mxu1 %v523_v8  ;;  %293 = vmatpush.bf16.msra.mxu2 %v523_v8  ;;  %p607_p3 = pnand %p606_p2, %p602_p13 }
  0x23   : > { %316 = vmatpush.bf16.msra.mxu3 %v523_v8  ;;  %247 = vmatpush.bf16.msra.mxu0 %v523_v8 }
  0x27   : > { %387 = vmatpush.bf16.msrb.mxu0 %v530_v32 }
  0x2b   : > { %388 = vmatpush.bf16.msrb.mxu0 %v529_v33 }
  0x2f   : > { %389 = vmatpush.bf16.msrb.mxu0 %v528_v34 }
  0x33   : > { %390 = vmatpush.bf16.msrb.mxu0 %v527_v35 }
  0x8a   : > { %v255_v11 = vpop.permute.xlu1 %254  ;;  %v278_v12 = vpop.permute.xlu0 %277 }
  0x8b   : > { %vm256_vm0 = vcmp.eq.s32.totalorder %v255_v11, %v196_v10  ;;  %vm279_vm1 = vcmp.eq.s32.totalorder %v278_v12, %v196_v10 }
  0x8c   : > { %v496_v14 = vsel %vm256_vm0, 1.0, %v651_v13  ;;  %v498_v15 = vsel %vm279_vm1, 1.0, %v651_v13 }
  0x8d   : > { %v259_v16 = vpack.c.bf16 %v496_v14, %v496_v14  ;;  %v282_v17 = vpack.c.bf16 %v498_v15, %v498_v15 }
  0x8f   : > { %497 = vmatmul.msk.bf16.vlgmr.msra.gmra.mxu1 %vm236_vm2, %v259_v16  ;;  %499 = vmatmul.msk.bf16.vlgmr.msra.gmra.mxu2 %vm236_vm2, %v282_v17 }
  0x93   : > { %v301_v18 = vpop.permute.xlu0 %300  ;;  %v199_v19 = vpop.permute.xlu1 %198 }
  0x94   : > { %vm302_vm3 = vcmp.eq.s32.totalorder %v301_v18, %v196_v10  ;;  %vm200_vm4 = vcmp.eq.s32.totalorder %v199_v19, %v196_v10 }
  0x95   : > { %v500_v20 = vsel %vm302_vm3, 1.0, %v651_v13  ;;  %v478_v21 = vsel %vm200_vm4, 1.0, %v651_v13 }
  0x96   : > { %v305_v22 = vpack.c.bf16 %v500_v20, %v500_v20  ;;  %v203_v23 = vpack.c.bf16 %v478_v21, %v478_v21 }
  0x98   : > { %501 = vmatmul.msk.bf16.vlgmr.msra.gmra.mxu3 %vm236_vm2, %v305_v22  ;;  %495 = vmatmul.msk.bf16.vlgmr.msra.gmra.mxu0 %vm236_vm2, %v203_v23 }
 0x10c   : > { %v272_v24 = vpop.f32.mrf.mxu1 }
 0x10d   : > { %323 = vrot.lane.b32.xlu2 %v272_v24, %s652_s14 }
 0x112   : > { %v295_v25 = vpop.f32.mrf.mxu2 }
 0x114   : > { %v274_v26 = vpop.f32.mrf.mxu1 }
 0x115   : > { %327 = vrot.lane.b32.xlu2 %v295_v25, %s653_s20  ;;  %v249_v30 = vpop.f32.mrf.mxu0 }
 0x11a   : > { %v297_v27 = vpop.f32.mrf.mxu2 }
 0x11b   : > { %v318_v28 = vpop.f32.mrf.mxu3 }
 0x11c   : > { %331 = vrot.lane.b32.xlu1 %v318_v28, %s654_s22  ;;  %s188_s22 = scalar_lea.vmem [#allocation3], %s476_s10 }
 0x11d   : > { %v251_v31 = vpop.f32.mrf.mxu0  ;;  %s410_s23 = sshll.u32 %s188_s22, 4  ;;  %s411_s23 = int_to_ptr.vmem [resolvable:$true] %s410_s23 }
 0x123   : > { %v320_v29 = vpop.f32.mrf.mxu3 }
 0x167   : > { %v324_v36 = vpop.permute.xlu2 %323 }
 0x168   : > { %v335_v37 = vsel %vm334_vm5, %v249_v30, %v324_v36 }
 0x16f   : > { %v328_v38 = vpop.permute.xlu2 %327 }
 0x170   : > { %v337_v39 = vsel %vm336_vm6, %v335_v37, %v328_v38 }
 0x18e   : > { %v332_v40 = vpop.permute.xlu1 %331 }
 0x18f   : > { %v339_v41 = vsel %vm338_vm7, %v337_v39, %v332_v40 }
 0x190   : > { %v340_v42 = vpack.c.bf16 %v339_v41, %v339_v41 }
 0x192   : > { %342 = vst.msk [vmem:[#allocation2] sm:$0xf] %vm341_vm8, %v340_v42 }
 0x199   : > { %v343_v43 = vld [vmem:[#allocation2] sm:$0xf] }
 0x19a   : > { %518 = vmatmul.msk.bf16.vlgmr.msrb.gmra.mxu0 %vm236_vm2, %v343_v43 }
 0x217   : > { %v392_v45 = vpop.f32.mrf.mxu0 }
 0x218   : > { %v393_v46 = vadd.f32 %v582_v44, %v392_v45 }
 0x21a   : > { %396 = vst.msk [vmem:[%s188_s22] sm:$0xff] %vm336_vm6, %v393_v46 }
 0x21b   : > { %610 = shalt.err (!%p607_p3)
}
 0x21c   : > { %531 = dma.vmem_to_hbm [thread:$0]  (%p718_p5), %s411_s23, 128, %s413_s27, %s398_s19  }
 0x21f   : > { %v394_v47 = vpop.f32.mrf.mxu0 }
 0x220 PF: > { %p537_p4 = scmp.ge.s32.totalorder %s645_s18, 2  ;;  %s424_s8 = sand.u32 1, %s633_s15  }
 0x221   : > { %s425_s10 = scalar_lea.sflag [#allocation4], %s424_s8 }
 0x222   : > { %p534_p7 = pnand %p537_p4, %p722_p6 }
 0x224   : > { %p535_p8 = pneg %p534_p7 }
 0x226   : > { %628 = dma.done.wait (%p535_p8), %s425_s10, 128  }
 0x227   : > { %630 = vsyncadd (%p535_p8), %s425_s10, 4294967168  ;;  %p14_p9 = scmp.ge.s32.totalorder %s705_s21, 4   ;;  %s806_s15 = smov %s637_s16 }
 0x228   : > { %s807_s16 = smov %s641_s17  ;;  %s808_s17 = smov %s716_s24 }
 0x229   : > { %s809_s18 = smov %s705_s21  ;;  %16 = sbr.rel (!%p14_p9) target bundleno = 3 (0x3), region = 71 }
 0x22e   :  { %431 = vsyncpa [#allocation4], 1 }
 0x22f   :  { %433 = vsyncpa [#allocation4 + $0x1], 1 }

</bundles_post_ra>
